<compile_context>
chip_gen: v6e
topology: v6e:2x2x1
jax: 0.10.0
libtpu: 0.0.40
codegen_flags: <defaults>
</compile_context>

<pallas_src>
import jax
import jax.numpy as jnp
from jax import lax
from jax.experimental import pallas as pl
from jax.experimental.pallas import tpu as pltpu


def _round_up(n, m):
    return ((n + m - 1) // m) * m


def snn_kernel(x_ref, w1_ref, b1_ref, w2_ref, b2_ref, w3_ref, b3_ref, o_ref):
    """One batch tile. Batch sits on the sublane axis of x and on the lane axis
    of everything downstream (so all output stores are lane-dense).

      x:  (TB, 10) f32   w1: (64, 10) f32   b1: (64, 1) f32
      h1: (64, TB) f32   w2: (32, 64) f32   b2: (32, 1) f32
      h2: (32, TB) f32   w3: (1, 32)  f32   b3: (1, 1)  f32
      o:  (1,  TB) f32
    """
    # Layer 1: Linear(10 -> 64) + ReLU.  Contract on x's feature (last) dim so
    # no wrapper-side transpose of x is needed; the result already has the
    # batch on the lane axis.
    h1 = lax.dot_general(
        w1_ref[...], x_ref[...],
        dimension_numbers=(((1,), (1,)), ((), ())),
        preferred_element_type=jnp.float32)                        # (64, TB)
    h1 = jnp.maximum(h1 + b1_ref[...], 0.0)

    # Layer 2: Linear(64 -> 32) + ReLU (MXU, f32 accumulate).
    h2 = jnp.dot(w2_ref[...], h1, preferred_element_type=jnp.float32)  # (32, TB)
    h2 = jnp.maximum(h2 + b2_ref[...], 0.0)

    # Layer 3: Linear(32 -> 1) on the MXU (keeps the VALU slot free).
    h3 = jnp.dot(w3_ref[...], h2, preferred_element_type=jnp.float32)  # (1, TB)
    h3 = h3 + b3_ref[...]

    # sigmoid(x) = 0.5 * (tanh(x/2) + 1): a single EUP tanh, no approx recip.
    o_ref[...] = 0.5 * (jnp.tanh(0.5 * h3) + 1.0)


def simple_snn_forward(x, params, *, tb=4096):
    """x: (B, 10) float32 -> (B, 1) float32. params in PyTorch layout."""
    w1, b1, w2, b2, w3, b3 = params  # w: (out, in), b: (out,)
    B, F = x.shape

    # Pad the batch only to lane granularity (128) so output stores stay
    # lane-dense; do NOT pad to a multiple of the tile size.
    B_pad = _round_up(B, 128)
    if B_pad != B:
        x = jnp.pad(x, ((0, B_pad - B), (0, 0)))

    # Batch tile: large enough to amortize per-step pipeline overhead, capped
    # at ~B_pad/2 so the grid has >=2 steps (v7x: work for both TensorCores)
    # whenever the batch allows it.
    half = _round_up(pl.cdiv(B_pad, 2), 128)
    TB = max(128, min(tb, half))
    num_steps = pl.cdiv(B_pad, TB)   # ragged final tile handled by Pallas
    grid = (num_steps,)

    # Weights / biases in the layouts the kernel expects (all f32, tiny).
    w1c = w1.astype(jnp.float32)                    # (64, 10)
    w2c = w2.astype(jnp.float32)                    # (32, 64)
    w3c = w3.astype(jnp.float32)                    # (1, 32)
    b1c = b1.reshape(-1, 1).astype(jnp.float32)     # (64, 1)
    b2c = b2.reshape(-1, 1).astype(jnp.float32)     # (32, 1)
    b3c = b3.reshape(1, 1).astype(jnp.float32)      # (1, 1)

    const = lambda a: pl.BlockSpec(a.shape, lambda i: (0,) * a.ndim)

    flops = 2 * B_pad * (10 * 64 + 64 * 32 + 32)
    bytes_accessed = (x.size * 4 + B_pad * 4
                      + (w1c.size + w2c.size + w3c.size
                         + b1c.size + b2c.size + b3c.size) * 4)

    out_t = pl.pallas_call(
        snn_kernel,
        out_shape=jax.ShapeDtypeStruct((1, B_pad), jnp.float32),
        grid=grid,
        in_specs=[
            pl.BlockSpec((TB, F), lambda i: (i, 0)),     # x tile, re-DMA'd per step
            const(w1c), const(b1c),                      # weights/biases stay resident
            const(w2c), const(b2c),
            const(w3c), const(b3c),
        ],
        out_specs=pl.BlockSpec((1, TB), lambda i: (0, i)),
        compiler_params=pltpu.CompilerParams(
            dimension_semantics=("parallel",)),
        cost_estimate=pl.CostEstimate(
            flops=flops, transcendentals=B_pad, bytes_accessed=bytes_accessed),
    )(x, w1c, b1c, w2c, b2c, w3c, b3c)

    # Back to PyTorch's (B, 1) convention, dropping batch padding.
    return out_t[0, :B].reshape(B, 1)


def init_params(key):
    """Deterministic init mimicking nn.Linear's U(-1/sqrt(fan_in), 1/sqrt(fan_in)).

    Kept in PyTorch layout: w (out_features, in_features), b (out_features,).
    """
    dims = [(10, 64), (64, 32), (32, 1)]
    params = []
    for fan_in, fan_out in dims:
        key, kw, kb = jax.random.split(key, 3)
        bound = 1.0 / jnp.sqrt(jnp.float32(fan_in))
        w = jax.random.uniform(kw, (fan_out, fan_in), jnp.float32, -bound, bound)
        b = jax.random.uniform(kb, (fan_out,), jnp.float32, -bound, bound)
        params.extend([w, b])
    return tuple(params)


def _reference(x, params):
    """Plain-JAX f32 reference of the PyTorch forward."""
    w1, b1, w2, b2, w3, b3 = params
    h1 = jax.nn.relu(x @ w1.T + b1)
    h2 = jax.nn.relu(h1 @ w2.T + b2)
    h3 = h2 @ w3.T + b3
    return jax.nn.sigmoid(h3)


if __name__ == "__main__":
    key = jax.random.PRNGKey(0)
    key, kx = jax.random.split(key)

    B = 8  # small demo batch
    x = jax.random.normal(kx, (B, 10), jnp.float32)
    params = init_params(key)

    out = simple_snn_forward(x, params)
    jax.block_until_ready(out)

    ref = _reference(x, params)
    assert out.shape == (B, 1), out.shape
    # All-f32 kernel; tolerance covers the MXU's default (bf16-pass) matmul
    # rounding vs. XLA's reference matmuls.
    assert jnp.allclose(out, ref, atol=5e-3, rtol=5e-3), (
        jnp.max(jnp.abs(out - ref)))

    print("KERNEL_OK")
</pallas_src>

<mosaic_0001>
module attributes {stable_mosaic.version = 11 : i64} {
  func.func @snn_kernel(%arg0: i32, %arg1: memref<128x10xf32, #tpu.memory_space<vmem>>, %arg2: memref<64x10xf32, #tpu.memory_space<vmem>>, %arg3: memref<64x1xf32, #tpu.memory_space<vmem>>, %arg4: memref<32x64xf32, #tpu.memory_space<vmem>>, %arg5: memref<32x1xf32, #tpu.memory_space<vmem>>, %arg6: memref<1x32xf32, #tpu.memory_space<vmem>>, %arg7: memref<1x1xf32, #tpu.memory_space<vmem>>, %arg8: memref<1x128xf32, #tpu.memory_space<vmem>>) attributes {dimension_semantics = [#tpu.dimension_semantics<parallel>], iteration_bounds = array<i64: 1>, scalar_prefetch = 0 : i64, scratch_operands = 0 : i64, tpu.core_type = #tpu.core_type<tc>, window_params = [{transform_indices = @transform_0, window_bounds = array<i64: 128, 10>}, {pipeline_mode = #tpu.pipeline_mode<synchronous>, transform_indices = @transform_1, window_bounds = array<i64: 64, 10>}, {pipeline_mode = #tpu.pipeline_mode<synchronous>, transform_indices = @transform_2, window_bounds = array<i64: 64, 1>}, {pipeline_mode = #tpu.pipeline_mode<synchronous>, transform_indices = @transform_3, window_bounds = array<i64: 32, 64>}, {pipeline_mode = #tpu.pipeline_mode<synchronous>, transform_indices = @transform_4, window_bounds = array<i64: 32, 1>}, {pipeline_mode = #tpu.pipeline_mode<synchronous>, transform_indices = @transform_5, window_bounds = array<i64: 1, 32>}, {pipeline_mode = #tpu.pipeline_mode<synchronous>, transform_indices = @transform_6, window_bounds = array<i64: 1, 1>}, {transform_indices = @transform_7, window_bounds = array<i64: 1, 128>}]} {
    %c0 = arith.constant 0 : index
    %c0_0 = arith.constant 0 : index
    %0 = vector.load %arg2[%c0, %c0_0] : memref<64x10xf32, #tpu.memory_space<vmem>>, vector<64x10xf32>
    %c0_1 = arith.constant 0 : index
    %c0_2 = arith.constant 0 : index
    %1 = vector.load %arg1[%c0_1, %c0_2] : memref<128x10xf32, #tpu.memory_space<vmem>>, vector<128x10xf32>
    %cst = arith.constant dense<0.000000e+00> : vector<64x128xf32>
    %2 = tpu.matmul %0, %1, %cst {dimension_numbers = #tpu.dot_dimension_numbers<[1], [1], [0], [0], [0, 0, 1, 0], [], []>} : vector<64x10xf32>, vector<128x10xf32>, vector<64x128xf32> -> vector<64x128xf32>
    %c0_3 = arith.constant 0 : index
    %c0_4 = arith.constant 0 : index
    %3 = vector.load %arg3[%c0_3, %c0_4] : memref<64x1xf32, #tpu.memory_space<vmem>>, vector<64x1xf32>
    %4 = vector.broadcast %3 : vector<64x1xf32> to vector<64x128xf32>
    %5 = arith.addf %2, %4 : vector<64x128xf32>
    %cst_5 = arith.constant 0.000000e+00 : f32
    %6 = vector.broadcast %cst_5 : f32 to vector<64x128xf32>
    %7 = arith.maximumf %5, %6 : vector<64x128xf32>
    %c0_6 = arith.constant 0 : index
    %c0_7 = arith.constant 0 : index
    %8 = vector.load %arg4[%c0_6, %c0_7] : memref<32x64xf32, #tpu.memory_space<vmem>>, vector<32x64xf32>
    %cst_8 = arith.constant dense<0.000000e+00> : vector<32x128xf32>
    %9 = tpu.matmul %8, %7, %cst_8 {dimension_numbers = #tpu.dot_dimension_numbers<[1], [0], [0], [1], [0, 0, 1, 1], [], []>} : vector<32x64xf32>, vector<64x128xf32>, vector<32x128xf32> -> vector<32x128xf32>
    %c0_9 = arith.constant 0 : index
    %c0_10 = arith.constant 0 : index
    %10 = vector.load %arg5[%c0_9, %c0_10] : memref<32x1xf32, #tpu.memory_space<vmem>>, vector<32x1xf32>
    %11 = vector.broadcast %10 : vector<32x1xf32> to vector<32x128xf32>
    %12 = arith.addf %9, %11 : vector<32x128xf32>
    %cst_11 = arith.constant 0.000000e+00 : f32
    %13 = vector.broadcast %cst_11 : f32 to vector<32x128xf32>
    %14 = arith.maximumf %12, %13 : vector<32x128xf32>
    %c0_12 = arith.constant 0 : index
    %c0_13 = arith.constant 0 : index
    %15 = vector.load %arg6[%c0_12, %c0_13] : memref<1x32xf32, #tpu.memory_space<vmem>>, vector<1x32xf32>
    %cst_14 = arith.constant dense<0.000000e+00> : vector<1x128xf32>
    %16 = tpu.matmul %15, %14, %cst_14 {dimension_numbers = #tpu.dot_dimension_numbers<[1], [0], [0], [1], [0, 0, 1, 1], [], []>} : vector<1x32xf32>, vector<32x128xf32>, vector<1x128xf32> -> vector<1x128xf32>
    %c0_15 = arith.constant 0 : index
    %c0_16 = arith.constant 0 : index
    %17 = vector.load %arg7[%c0_15, %c0_16] : memref<1x1xf32, #tpu.memory_space<vmem>>, vector<1x1xf32>
    %18 = vector.broadcast %17 : vector<1x1xf32> to vector<1x128xf32>
    %19 = arith.addf %16, %18 : vector<1x128xf32>
    %cst_17 = arith.constant 5.000000e-01 : f32
    %20 = vector.broadcast %cst_17 : f32 to vector<1x128xf32>
    %21 = arith.mulf %20, %19 : vector<1x128xf32>
    %22 = math.tanh %21 : vector<1x128xf32>
    %cst_18 = arith.constant 1.000000e+00 : f32
    %23 = vector.broadcast %cst_18 : f32 to vector<1x128xf32>
    %24 = arith.addf %22, %23 : vector<1x128xf32>
    %cst_19 = arith.constant 5.000000e-01 : f32
    %25 = vector.broadcast %cst_19 : f32 to vector<1x128xf32>
    %26 = arith.mulf %25, %24 : vector<1x128xf32>
    %c0_20 = arith.constant 0 : index
    %c0_21 = arith.constant 0 : index
    %27 = vector.load %arg8[%c0_20, %c0_21] : memref<1x128xf32, #tpu.memory_space<vmem>>, vector<1x128xf32>
    tpu.vector_store %arg8[%c0_20, %c0_21], %26 {strides = array<i32>} : memref<1x128xf32, #tpu.memory_space<vmem>>, vector<1x128xf32>,
    return
  }
  func.func @transform_0(%arg0: i32) -> (i32, i32) {
    %c0_i32 = arith.constant 0 : i32
    %c0_i32_0 = arith.constant 0 : i32
    return %arg0, %c0_i32 : i32, i32
  }
  func.func @transform_1(%arg0: i32) -> (i32, i32) {
    %c0_i32 = arith.constant 0 : i32
    %c0_i32_0 = arith.constant 0 : i32
    %c0_i32_1 = arith.constant 0 : i32
    return %c0_i32, %c0_i32_0 : i32, i32
  }
  func.func @transform_2(%arg0: i32) -> (i32, i32) {
    %c0_i32 = arith.constant 0 : i32
    %c0_i32_0 = arith.constant 0 : i32
    %c0_i32_1 = arith.constant 0 : i32
    return %c0_i32, %c0_i32_0 : i32, i32
  }
  func.func @transform_3(%arg0: i32) -> (i32, i32) {
    %c0_i32 = arith.constant 0 : i32
    %c0_i32_0 = arith.constant 0 : i32
    %c0_i32_1 = arith.constant 0 : i32
    return %c0_i32, %c0_i32_0 : i32, i32
  }
  func.func @transform_4(%arg0: i32) -> (i32, i32) {
    %c0_i32 = arith.constant 0 : i32
    %c0_i32_0 = arith.constant 0 : i32
    %c0_i32_1 = arith.constant 0 : i32
    return %c0_i32, %c0_i32_0 : i32, i32
  }
  func.func @transform_5(%arg0: i32) -> (i32, i32) {
    %c0_i32 = arith.constant 0 : i32
    %c0_i32_0 = arith.constant 0 : i32
    %c0_i32_1 = arith.constant 0 : i32
    return %c0_i32, %c0_i32_0 : i32, i32
  }
  func.func @transform_6(%arg0: i32) -> (i32, i32) {
    %c0_i32 = arith.constant 0 : i32
    %c0_i32_0 = arith.constant 0 : i32
    %c0_i32_1 = arith.constant 0 : i32
    return %c0_i32, %c0_i32_0 : i32, i32
  }
  func.func @transform_7(%arg0: i32) -> (i32, i32) {
    %c0_i32 = arith.constant 0 : i32
    %c0_i32_0 = arith.constant 0 : i32
    return %c0_i32, %arg0 : i32, i32
  }
}

</mosaic_0001>

<bundles_post_ra>
// kernel: tpu_custom_call.1
= control target key start
LH: loop header
LB: loop body
LE: loop exit
PB: predicated region body
PF: predicated region fallthrough
CT: control target
= control target key end

     0   :  { %s915_s0 = inlined_call_operand.vmem [shape: f32[128,10], index: 0, kind: input, shape index: {}]   ;;  %s916_s1 = inlined_call_operand.vmem [shape: f32[64,10], index: 1, kind: input, shape index: {}]   ;;  %s917_s2 = inlined_call_operand.vmem [shape: f32[64,1], index: 2, kind: input, shape index: {}]   ;;  %s918_s3 = inlined_call_operand.vmem [shape: f32[32,64], index: 3, kind: input, shape index: {}]   ;;  %s919_s4 = inlined_call_operand.vmem [shape: f32[32,1], index: 4, kind: input, shape index: {}]   ;;  %s920_s5 = inlined_call_operand.vmem [shape: f32[1,32], index: 5, kind: input, shape index: {}]   ;;  %s921_s6 = inlined_call_operand.<no memory space> [shape: f32[1,1], index: 6, kind: input, shape index: {}]   ;;  %s922_s7 = inlined_call_operand.hbm [shape: f32[1,128], index: 7, kind: output, shape index: {}]  }
   0x1   :  { %v12_v0 = vstv %s921_s6 }
   0x2   :  { %13 = vst [vmem:[#allocation2] sm:$0x1] %v12_v0 }
   0x3   :  { %v52_v1 = vld [vmem:[%s915_s0 + $0x78] sm:$0xff]  ;;  %vm101_vm0 = vcmask 80896   ;;  %v51_v2 = vld [vmem:[%s915_s0 + $0x70] sm:$0xff]  ;;  %v698_v3 = vmov 0   ;;  %v50_v4 = vld [vmem:[%s915_s0 + $0x68] sm:$0xff] }
   0x4   :  { %591 = vmatprep.subr.msk.mxu0 %vm101_vm0, %v52_v1  ;;  %672 = vset.pattern.permute.xlu0 %v698_v3  ;;  %v29_v5 = vld [vmem:[%s916_s1] sm:$0xff]  ;;  %v60_v7 = vld [vmem:[%s917_s2 + $0x38] sm:$0xff]  ;;  %v58_v8 = vld [vmem:[%s917_s2 + $0x28] sm:$0xff] }
   0x5   :  { %592 = vmatpush3.xpose.msk.msra.mxu0 %vm101_vm0, %v52_v1  ;;  %673 = vset.pattern.permute.xlu1 %v698_v3  ;;  %v49_v6 = vld [vmem:[%s915_s0 + $0x60] sm:$0xff]  ;;  %v59_v9 = vld [vmem:[%s917_s2 + $0x30] sm:$0xff]  ;;  %v48_v11 = vld [vmem:[%s915_s0 + $0x58] sm:$0xff] }
   0x6   :  { %593 = vmatprep.subr.msk.mxu0 %vm101_vm0, %v51_v2  ;;  %623 = vmatprep.mubr.msk.f32.mxu0 %vm101_vm0, %v29_v5  ;;  %v57_v10 = vld [vmem:[%s917_s2 + $0x20] sm:$0xff] }
   0x7   :  { %98 = vperm.xlu0 %672, %v60_v7   ;;  %88 = vperm.xlu1 %673, %v58_v8  }
   0x9   :  { %594 = vmatpush3.xpose.msk.msra.mxu0 %vm101_vm0, %v51_v2 }
   0xa   :  { %595 = vmatprep.subr.msk.mxu0 %vm101_vm0, %v50_v4 }
   0xd   :  { %596 = vmatpush3.xpose.msk.msra.mxu0 %vm101_vm0, %v50_v4 }
   0xe   :  { %597 = vmatprep.subr.msk.mxu0 %vm101_vm0, %v49_v6 }
   0xf   :  { %14 = vsyncpa [#allocation4], 0  ;;  %93 = vperm.xlu0 %672, %v59_v9   ;;  %83 = vperm.xlu1 %673, %v57_v10   ;;  %v56_v12 = vld [vmem:[%s917_s2 + $0x18] sm:$0xff]  ;;  %v55_v13 = vld [vmem:[%s917_s2 + $0x10] sm:$0xff]  ;;  %vm315_vm1 = vcmask 523264   ;;  %vm700_vm2 = vmmov 0  }
  0x10   :  { %v47_v14 = vld [vmem:[%s915_s0 + $0x50] sm:$0xff]  ;;  %v54_v15 = vld [vmem:[%s917_s2 + $0x8] sm:$0xff]  ;;  %v53_v16 = vld [vmem:[%s917_s2] sm:$0xff]  ;;  %vm428_vm3 = vcmask 261120   ;;  %s701_s29 = smov [#allocation3]  }
  0x11   :  { %598 = vmatpush3.xpose.msk.msra.mxu0 %vm101_vm0, %v49_v6  ;;  %v46_v17 = vld [vmem:[%s915_s0 + $0x48] sm:$0xff]  ;;  %v294_v18 = vld [vmem:[%s919_s4 + $0x18] sm:$0xff]  ;;  %v293_v19 = vld [vmem:[%s919_s4 + $0x10] sm:$0xff]  ;;  %s513_s6 = sshll.u32 %s701_s29, 4  ;;  %s514_s6 = int_to_ptr.vmem [resolvable:$true] %s513_s6 }
  0x12   :  { %599 = vmatprep.subr.msk.mxu0 %vm101_vm0, %v48_v11  ;;  %v45_v20 = vld [vmem:[%s915_s0 + $0x40] sm:$0xff]  ;;  %v292_v21 = vld [vmem:[%s919_s4 + $0x8] sm:$0xff]  ;;  %v44_v23 = vld [vmem:[%s915_s0 + $0x38] sm:$0xff]  ;;  %s680_s30 = scalar_lea.vmem %s514_s6, 32  ;;  %p681_p1 = scmp.lt.s32.totalorder %s514_s6, %s514_s6 }
  0x13   :  { %78 = vperm.xlu0 %672, %v56_v12   ;;  %73 = vperm.xlu1 %673, %v55_v13   ;;  %v291_v22 = vld [vmem:[%s919_s4] sm:$0xff]  ;;  %v43_v25 = vld [vmem:[%s915_s0 + $0x30] sm:$0xff]  ;;  %v42_v26 = vld [vmem:[%s915_s0 + $0x28] sm:$0xff] }
  0x14   :  { %v418_v24 = vld [vmem:[#allocation2] sm:$0x1]  ;;  %v40_v28 = vld [vmem:[%s915_s0 + $0x18] sm:$0xff]  ;;  %v39_v29 = vld [vmem:[%s915_s0 + $0x10] sm:$0xff] }
  0x15   :  { %600 = vmatpush3.xpose.msk.msra.mxu0 %vm101_vm0, %v48_v11  ;;  %v41_v27 = vld [vmem:[%s915_s0 + $0x20] sm:$0xff]  ;;  %v38_v30 = vld [vmem:[%s915_s0 + $0x8] sm:$0xff]  ;;  %v31_v33 = vld [vmem:[%s916_s1 + $0x10] sm:$0xff]  ;;  %v699_v11 = vmov 0.0  }
  0x16   :  { %601 = vmatprep.subr.msk.mxu0 %vm101_vm0, %v47_v14  ;;  %v37_v31 = vld [vmem:[%s915_s0] sm:$0xff]  ;;  %v30_v32 = vld [vmem:[%s916_s1 + $0x8] sm:$0xff]  ;;  %v32_v34 = vld [vmem:[%s916_s1 + $0x18] sm:$0xff] }
  0x17   :  { %68 = vperm.xlu0 %672, %v54_v15   ;;  %63 = vperm.xlu1 %673, %v53_v16   ;;  %v33_v35 = vld [vmem:[%s916_s1 + $0x20] sm:$0xff]  ;;  %v34_v36 = vld [vmem:[%s916_s1 + $0x28] sm:$0xff]  ;;  %v35_v37 = vld [vmem:[%s916_s1 + $0x30] sm:$0xff] }
  0x18   :  { %v36_v38 = vld [vmem:[%s916_s1 + $0x38] sm:$0xff]  ;;  %v287_v39 = vld [vmem:[%s918_s3] sm:$0xff]  ;;  %v288_v8 = vld [vmem:[%s918_s3 + $0x8] sm:$0xff] }
  0x19   :  { %602 = vmatpush3.xpose.msk.msra.mxu0 %vm101_vm0, %v47_v14  ;;  %651 = vmatprep.mubr.msk.f32.mxu1 %vm315_vm1, %v287_v39  ;;  %v289_v9 = vld [vmem:[%s918_s3 + $0x10] sm:$0xff]  ;;  %v290_v10 = vld [vmem:[%s918_s3 + $0x18] sm:$0xff] }
  0x1a   :  { %603 = vmatprep.subr.msk.mxu0 %vm101_vm0, %v46_v17 }
  0x1b   :  { %312 = vperm.xlu0 %672, %v294_v18   ;;  %307 = vperm.xlu1 %673, %v293_v19  }
  0x1d   :  { %604 = vmatpush3.xpose.msk.msra.mxu0 %vm101_vm0, %v46_v17 }
  0x1e   :  { %605 = vmatprep.subr.msk.mxu0 %vm101_vm0, %v45_v20 }
  0x1f   :  { %302 = vperm.xlu0 %672, %v292_v21   ;;  %297 = vperm.xlu1 %673, %v291_v22  }
  0x21   :  { %606 = vmatpush3.xpose.msk.msra.mxu0 %vm101_vm0, %v45_v20 }
  0x22   :  { %607 = vmatprep.subr.msk.mxu0 %vm101_vm0, %v44_v23 }
  0x23   :  { %421 = vperm.xlu0 %672, %v418_v24  }
  0x25   :  { %608 = vmatpush3.xpose.msk.msra.mxu0 %vm101_vm0, %v44_v23 }
  0x26   :  { %609 = vmatprep.subr.msk.mxu0 %vm101_vm0, %v43_v25 }
  0x29   :  { %610 = vmatpush3.xpose.msk.msra.mxu0 %vm101_vm0, %v43_v25 }
  0x2a   :  { %611 = vmatprep.subr.msk.mxu0 %vm101_vm0, %v42_v26 }
  0x2d   :  { %612 = vmatpush3.xpose.msk.msra.mxu0 %vm101_vm0, %v42_v26 }
  0x2e   :  { %613 = vmatprep.subr.msk.mxu0 %vm101_vm0, %v41_v27 }
  0x31   :  { %614 = vmatpush3.xpose.msk.msra.mxu0 %vm101_vm0, %v41_v27 }
  0x32   :  { %615 = vmatprep.subr.msk.mxu0 %vm101_vm0, %v40_v28 }
  0x35   :  { %616 = vmatpush3.xpose.msk.msra.mxu0 %vm101_vm0, %v40_v28  ;;  %v417_v28 = vld [vmem:[%s920_s5] sm:$0x1]  ;;  %s676_s5 = scalar_lea.vmem %s514_s6, 16 }
  0x36   :  { %617 = vmatprep.subr.msk.mxu0 %vm101_vm0, %v39_v29  ;;  %p677_p0 = scmp.ne.s32.totalorder %s514_s6, %s676_s5  ;;  %p682_p2 = scmp.lt.s32.totalorder %s680_s30, %s676_s5 }
  0x38   :  { %p683_p3 = por %p682_p2, %p681_p1 }
  0x39   :  { %618 = vmatpush3.xpose.msk.msra.mxu0 %vm101_vm0, %v39_v29  ;;  %v424_v29 = vlaneseq }
  0x3a   :  { %619 = vmatprep.subr.msk.mxu0 %vm101_vm0, %v38_v30  ;;  %p684_p4 = pnand %p683_p3, %p677_p0 }
  0x3d   :  { %620 = vmatpush3.xpose.msk.msra.mxu0 %vm101_vm0, %v38_v30  ;;  %v425_v30 = vshrl.u32 %v424_v29, 7 }
  0x3e   :  { %621 = vmatprep.subr.msk.mxu0 %vm101_vm0, %v37_v31 }
  0x41   :  { %622 = vmatpush3.xpose.msk.msra.mxu0 %vm101_vm0, %v37_v31  ;;  %v426_v31 = vsub.s32 0, %v425_v30 }
  0x44   :  { %624 = vmatmul.mubr.msk.f32.vlgmr.msra.gmra.mxu0 %vm101_vm0, %v30_v32 }
  0x45   :  { %626 = vmatprep.mubr.msk.f32.mxu0 %vm101_vm0, %v31_v33 }
  0x48   :  { %627 = vmatmul.mubr.msk.f32.gmra.mxu0 %vm101_vm0, %v32_v34 }
  0x49   :  { %629 = vmatprep.mubr.msk.f32.mxu0 %vm101_vm0, %v33_v35 }
  0x4c   :  { %630 = vmatmul.mubr.msk.f32.gmra.mxu0 %vm101_vm0, %v34_v36 }
  0x4d   :  { %632 = vmatprep.mubr.msk.f32.mxu0 %vm101_vm0, %v35_v37 }
  0x50   :  { %633 = vmatmul.mubr.msk.f32.gmra.mxu0 %vm101_vm0, %v36_v38 }
  0x82   :  { %v99_v42 = vpop.permute.xlu0 %98  ;;  %v89_v43 = vpop.permute.xlu1 %88 }
  0x8a   :  { %v94_v47 = vpop.permute.xlu0 %93  ;;  %v84_v48 = vpop.permute.xlu1 %83 }
  0x8e   :  { %v79_v56 = vpop.permute.xlu0 %78  ;;  %v74_v57 = vpop.permute.xlu1 %73 }
  0x92   :  { %v69_v0 = vpop.permute.xlu0 %68  ;;  %v64_v1 = vpop.permute.xlu1 %63 }
  0x96   :  { %v313_v12 = vpop.permute.xlu0 %312  ;;  %v308_v14 = vpop.permute.xlu1 %307 }
  0x9a   :  { %v303_v18 = vpop.permute.xlu0 %302  ;;  %v298_v23 = vpop.permute.xlu1 %297 }
  0x9e   :  { %v422_v32 = vpop.permute.xlu0 %421 }
  0x9f   :  { %v427_v33 = vrot.slane %v422_v32, %v426_v31 }
 0x104   :  { %v625_v40 = vpop.f32.mrf.mxu0 }
 0x105   :  { %v246_v2 = vadd.f32 %v625_v40, %v69_v0 }
 0x106   :  { %v240_v41 = vpop.f32.mrf.mxu0 }
 0x107   :  { %v241_v4 = vadd.f32 %v240_v41, %v64_v1  ;;  %v280_v6 = vmax.f32 %v246_v2, 0.0 }
 0x108   :  { %v628_v44 = vpop.f32.mrf.mxu0 }
 0x109   :  { %v256_v60 = vadd.f32 %v628_v44, %v79_v56  ;;  %v279_v7 = vmax.f32 %v241_v4, 0.0 }
 0x10a   :  { %v250_v45 = vpop.f32.mrf.mxu0 }
 0x10b   :  { %v251_v62 = vadd.f32 %v250_v45, %v74_v57  ;;  %v282_v3 = vmax.f32 %v256_v60, 0.0 }
 0x10c   :  { %v631_v46 = vpop.f32.mrf.mxu0 }
 0x10d   :  { %v266_v53 = vadd.f32 %v631_v46, %v89_v43  ;;  %v281_v5 = vmax.f32 %v251_v62, 0.0 }
 0x10e   :  { %v260_v49 = vpop.f32.mrf.mxu0 }
 0x10f   :  { %v261_v58 = vadd.f32 %v260_v49, %v84_v48  ;;  %v284_v61 = vmax.f32 %v266_v53, 0.0 }
 0x110   :  { %v634_v50 = vpop.f32.mrf.mxu0 }
 0x111   :  { %v276_v51 = vadd.f32 %v634_v50, %v99_v42  ;;  %v283_v63 = vmax.f32 %v261_v58, 0.0 }
 0x112   :  { %v270_v52 = vpop.f32.mrf.mxu0 }
 0x113   :  { %v286_v54 = vmax.f32 %v276_v51, 0.0  ;;  %v271_v55 = vadd.f32 %v270_v52, %v94_v47 }
 0x115   :  { %v285_v59 = vmax.f32 %v271_v55, 0.0  ;;  %635 = vmatprep.subr.mxu1 %v286_v54 }
 0x116   :  { %636 = vmatpush3.msra.mxu1 %v286_v54 }
 0x117   :  { %637 = vmatprep.subr.mxu1 %v285_v59 }
 0x118   :  { %638 = vmatpush3.msra.mxu1 %v285_v59 }
 0x119   :  { %639 = vmatprep.subr.mxu1 %v284_v61 }
 0x11a   :  { %640 = vmatpush3.msra.mxu1 %v284_v61 }
 0x11b   :  { %641 = vmatprep.subr.mxu1 %v283_v63 }
 0x11c   :  { %642 = vmatpush3.msra.mxu1 %v283_v63 }
 0x11d   :  { %643 = vmatprep.subr.mxu1 %v282_v3 }
 0x11e   :  { %644 = vmatpush3.msra.mxu1 %v282_v3 }
 0x11f   :  { %645 = vmatprep.subr.mxu1 %v281_v5 }
 0x120   :  { %646 = vmatpush3.msra.mxu1 %v281_v5 }
 0x121   :  { %647 = vmatprep.subr.mxu1 %v280_v6 }
 0x122   :  { %648 = vmatpush3.msra.mxu1 %v280_v6 }
 0x123   :  { %649 = vmatprep.subr.mxu1 %v279_v7 }
 0x124   :  { %650 = vmatpush3.msra.mxu1 %v279_v7 }
 0x125   :  { %652 = vmatmul.mubr.msk.f32.vlgmr.msra.gmra.mxu1 %vm315_vm1, %v288_v8  ;;  %657 = vmatprep.subr.mxu1 %v699_v11 }
 0x126   :  { %654 = vmatprep.mubr.msk.f32.mxu1 %vm315_vm1, %v289_v9 }
 0x129   :  { %655 = vmatmul.mubr.msk.f32.gmra.mxu1 %vm315_vm1, %v290_v10 }
 0x12a   :  { %665 = vmatprep.mubr.msk.f32.mxu1 %vm700_vm2, %v699_v11 }
 0x1e5   :  { %v653_v13 = vpop.f32.mrf.mxu1 }
 0x1e6   :  { %v400_v20 = vadd.f32 %v653_v13, %v303_v18 }
 0x1e7   :  { %v394_v15 = vpop.f32.mrf.mxu1 }
 0x1e8   :  { %v395_v24 = vadd.f32 %v394_v15, %v298_v23  ;;  %v414_v26 = vmax.f32 %v400_v20, 0.0 }
 0x1e9   :  { %v656_v16 = vpop.f32.mrf.mxu1 }
 0x1ea   :  { %v410_v17 = vadd.f32 %v656_v16, %v313_v12  ;;  %v413_v27 = vmax.f32 %v395_v24, 0.0 }
 0x1eb   :  { %v404_v19 = vpop.f32.mrf.mxu1 }
 0x1ec   :  { %v416_v21 = vmax.f32 %v410_v17, 0.0  ;;  %v405_v22 = vadd.f32 %v404_v19, %v308_v14 }
 0x1ee   :  { %v415_v25 = vmax.f32 %v405_v22, 0.0  ;;  %658 = vmatpush3.msra.mxu1 %v416_v21 }
 0x1ef   :  { %659 = vmatprep.subr.mxu1 %v699_v11 }
 0x1f0   :  { %660 = vmatpush3.msra.mxu1 %v415_v25 }
 0x1f1   :  { %661 = vmatprep.subr.mxu1 %v699_v11 }
 0x1f2   :  { %662 = vmatpush3.msra.mxu1 %v414_v26 }
 0x1f3   :  { %663 = vmatprep.subr.mxu1 %v699_v11 }
 0x1f4   :  { %664 = vmatpush3.msra.mxu1 %v413_v27 }
 0x1f5   :  { %666 = vmatmul.mubr.msk.f32.vlgmr.msra.gmra.mxu1 %vm428_vm3, %v417_v28 }
 0x2b5   :  { %v498_v34 = vpop.f32.mrf.mxu1 }
 0x2b6   :  { %v499_v35 = vadd.f32 %v498_v34, %v427_v33 }
 0x2b7   :  { %v667_v36 = vpop.f32.mrf.mxu1 }
 0x2b8   :  { %v502_v37 = vmul.f32 0.5, %v499_v35 }
 0x2ba   :  { %674 = vtanh.f32 %v502_v37 }
 0x2c7   :  { %v675_v38 = vpop.eup %674 }
 0x2c8   :  { %v504_v39 = vadd.f32 1.0, %v675_v38 }
 0x2ca   :  { %v505_v40 = vmul.f32 0.5, %v504_v39 }
 0x2cc   :  { %506 = vst [vmem:[#allocation3] sm:$0x1] %v505_v40 }
 0x2cd   :  { %687 = shalt.err (!%p684_p4)
}
 0x2ce   :  { %516 = dma.vmem_to_hbm [thread:$0]  %s514_s6, 16, %s922_s7, [#allocation4]  }
 0x2cf   :  { %696 = dma.done.wait [#allocation4], 16  }
 0x2d0   :  { %697 = vsyncadd [#allocation4], 4294967280 }
 0x2d1   :  { %520 = vsyncpa [#allocation4], 1 }

</bundles_post_ra>
